<compile_context>
chip_gen: v6e
topology: v6e:2x2x1
jax: 0.10.0
libtpu: 0.0.40
codegen_flags: <defaults>
</compile_context>

<pallas_src>
import functools

import jax
import jax.numpy as jnp
import numpy as np
from jax.experimental import pallas as pl
from jax.experimental.pallas import tpu as pltpu


def _local_attn_kernel(x_ref, wqkv_ref, bqkv_ref, bias_ref, wout_ref, bout_ref,
                       o_ref, *, windows, tokens, heads, head_dim,
                       compute_dtype, approx_recip):
    """One grid step processes `windows` windows = windows*tokens rows."""
    C = heads * head_dim
    rows = windows * tokens

    x = x_ref[...].astype(compute_dtype)                         # (rows, C)

    # Fused QKV projection for the whole block of windows (one large MXU matmul).
    # q-scale is already folded into wqkv/bqkv.
    qkv = jnp.dot(x, wqkv_ref[...], preferred_element_type=jnp.float32)
    qkv = (qkv + bqkv_ref[...]).astype(compute_dtype)            # (rows, 3C)

    # One slice per q/k/v (at multiples of C) + one reshape each; the per-head
    # slices in the loop below are small static lane slices of width head_dim.
    q_all = qkv[:, 0 * C:1 * C].reshape(windows, tokens, C)
    k_all = qkv[:, 1 * C:2 * C].reshape(windows, tokens, C)
    v_all = qkv[:, 2 * C:3 * C].reshape(windows, tokens, C)

    head_outs = []
    for h in range(heads):                                       # static, small; amortized over WB
        lo = h * head_dim
        qh = q_all[..., lo:lo + head_dim]                        # (windows, N, hd)
        kh = k_all[..., lo:lo + head_dim]
        vh = v_all[..., lo:lo + head_dim]

        # Batched attention: every window in the block is one batch element.
        s = jnp.einsum("bqd,bkd->bqk", qh, kh,
                       preferred_element_type=jnp.float32)       # (windows, N, N) f32
        s = s + bias_ref[h]                                      # rel-pos bias (f32)
        s = s - jnp.max(s, axis=-1, keepdims=True)               # stable softmax in f32
        e = jnp.exp(s)
        denom = jnp.sum(e, axis=-1, keepdims=True)
        if approx_recip:
            p = e * pl.reciprocal(denom, approx=True)            # EUP slot (fast path)
        else:
            p = e / denom                                        # exact (f32 path)

        oh = jnp.einsum("bqk,bkd->bqd", p.astype(compute_dtype), vh,
                        preferred_element_type=jnp.float32)      # (windows, N, hd)
        head_outs.append(oh.reshape(rows, head_dim))             # merge leading dims: free

    attn_out = jnp.concatenate(head_outs, axis=-1)               # (rows, C), f32

    # Output projection (one large MXU matmul for the whole block).
    out = jnp.dot(attn_out.astype(compute_dtype), wout_ref[...],
                  preferred_element_type=jnp.float32)
    out = out + bout_ref[...]
    o_ref[...] = out.astype(o_ref.dtype)


def _choose_windows_per_block(BW, N, C, heads, *,
                              budget_bytes=20 << 20, max_rows=4096, target_grid=2):
    """Pick windows-per-block.

    Largest divisor of BW whose (conservative f32) working set fits the VMEM budget,
    preferring a choice that leaves at least `target_grid` grid steps so multi-
    TensorCore chips (v7x) can split the "parallel" grid axis and the auto-pipeline
    can overlap DMA with compute.  Budget is sized for v7x's smaller VMEM.
    """
    def feasible(wb):
        rows = wb * N
        if rows > max_rows:
            return False
        if rows % 8 != 0 and wb != BW:       # keep the (8,128) block constraint satisfiable
            return False
        est = 4 * (4 * rows * C              # x block + out block (double-buffered)
                   + 3 * rows * C            # qkv intermediate
                   + 2 * rows * C            # attention output + temporaries
                   + wb * heads * N * N)     # score tiles
        return est <= budget_bytes

    divisors = [d for d in range(1, BW + 1) if BW % d == 0]
    ok = [d for d in divisors if feasible(d)]
    if not ok:
        return BW if N % 8 else 1
    multi = [d for d in ok if BW // d >= target_grid]
    return max(multi) if multi else max(ok)


def local_attention(x, params, *, heads, window_size,
                    compute_dtype=jnp.float32, approx_softmax=None):
    """x: (B, C, H, W) float32.  Returns (out, None, None) like the PyTorch module."""
    Wh, Ww = window_size
    B, C, H, W = x.shape
    assert H % Wh == 0 and W % Ww == 0 and C % heads == 0
    r1, r2 = H // Wh, W // Ww
    N = Wh * Ww
    head_dim = C // heads
    scale = head_dim ** (-0.5)
    BW = B * r1 * r2
    if approx_softmax is None:
        approx_softmax = (compute_dtype != jnp.float32)

    # b c (r1 h1) (r2 w1) -> ((b r1 r2) (h1 w1)) c
    xw = x.reshape(B, C, r1, Wh, r2, Ww)
    xw = jnp.transpose(xw, (0, 2, 4, 3, 5, 1)).reshape(BW * N, C)

    # relative position bias -> (heads, N, N); stays f32 (added to f32 scores).
    rpi = params["relative_position_index"]                   # (N, N) int32
    table = params["relative_position_bias_table"]            # ((2Wh-1)(2Ww-1), heads)
    bias = table[rpi.reshape(-1)].reshape(N, N, heads)
    bias = jnp.transpose(bias, (2, 0, 1)).astype(jnp.float32)

    # Fold the q-scale into the q-columns of the qkv projection (exact for
    # power-of-two head_dim); removes an N x C VPU multiply per window.
    col_scale = jnp.concatenate([jnp.full((C,), scale, jnp.float32),
                                 jnp.ones((2 * C,), jnp.float32)])
    w_qkv = (params["w_qkv"] * col_scale[None, :]).astype(compute_dtype)
    b_qkv = (params["b_qkv"] * col_scale[None, :]).astype(jnp.float32)
    w_out = params["w_out"].astype(compute_dtype)
    b_out = params["b_out"].astype(jnp.float32)

    WB = _choose_windows_per_block(BW, N, C, heads)
    rows = WB * N
    grid = (BW // WB,)

    kernel = functools.partial(
        _local_attn_kernel, windows=WB, tokens=N, heads=heads, head_dim=head_dim,
        compute_dtype=compute_dtype, approx_recip=approx_softmax)

    out = pl.pallas_call(
        kernel,
        out_shape=jax.ShapeDtypeStruct((BW * N, C), x.dtype),
        grid=grid,
        in_specs=[
            pl.BlockSpec((rows, C), lambda i: (i, 0)),           # WB windows of tokens
            pl.BlockSpec((C, 3 * C), lambda i: (0, 0)),          # W_qkv (scale folded), resident
            pl.BlockSpec((1, 3 * C), lambda i: (0, 0)),          # b_qkv (scale folded), resident
            pl.BlockSpec((heads, N, N), lambda i: (0, 0, 0)),    # rel-pos bias, resident
            pl.BlockSpec((C, C), lambda i: (0, 0)),              # W_out, resident
            pl.BlockSpec((1, C), lambda i: (0, 0)),              # b_out, resident
        ],
        out_specs=pl.BlockSpec((rows, C), lambda i: (i, 0)),
        compiler_params=pltpu.CompilerParams(
            dimension_semantics=("parallel",),
            vmem_limit_bytes=32 * 1024 * 1024),
    )(xw, w_qkv, b_qkv, bias, w_out, b_out)

    # ((b r1 r2) (h1 w1)) c -> b c (r1 h1) (r2 w1)
    out = out.reshape(B, r1, r2, Wh, Ww, C)
    out = jnp.transpose(out, (0, 5, 1, 3, 2, 4)).reshape(B, C, H, W)
    return out, None, None


def make_params(key, dim, heads, window_size):
    Wh, Ww = window_size
    k1, k2, k3, k4, k5 = jax.random.split(key, 5)

    # nn.Linear(dim, 3*dim): torch weight is (3*dim, dim); stored transposed for x @ W.
    w_qkv = jax.random.normal(k1, (dim, 3 * dim), jnp.float32) * 0.02
    b_qkv = jax.random.normal(k2, (1, 3 * dim), jnp.float32) * 0.02
    w_out = jax.random.normal(k3, (dim, dim), jnp.float32) * 0.02
    b_out = jax.random.normal(k4, (1, dim), jnp.float32) * 0.02
    # trunc_normal_(std=0.01) approximated deterministically with a normal draw.
    table = jax.random.normal(k5, ((2 * Wh - 1) * (2 * Ww - 1), heads), jnp.float32) * 0.01

    # relative_position_index (same construction as the PyTorch module)
    coords_h = np.arange(Wh)
    coords_w = np.arange(Ww)
    coords = np.stack(np.meshgrid(coords_h, coords_w, indexing="ij"))   # (2, Wh, Ww)
    coords_flatten = coords.reshape(2, -1)                              # (2, N)
    rel = coords_flatten[:, :, None] - coords_flatten[:, None, :]       # (2, N, N)
    rel = rel.transpose(1, 2, 0).astype(np.int64)                       # (N, N, 2)
    rel[:, :, 0] += Wh - 1
    rel[:, :, 1] += Ww - 1
    rel[:, :, 0] *= 2 * Ww - 1
    rpi = rel.sum(-1).astype(np.int32)                                  # (N, N)

    return {
        "w_qkv": w_qkv, "b_qkv": b_qkv,
        "w_out": w_out, "b_out": b_out,
        "relative_position_bias_table": table,
        "relative_position_index": jnp.asarray(rpi),
    }


def local_attention_ref(x, params, *, heads, window_size):
    """Pure-JAX reference mirroring the PyTorch forward (eval mode)."""
    Wh, Ww = window_size
    B, C, H, W = x.shape
    r1, r2 = H // Wh, W // Ww
    N = Wh * Ww
    head_dim = C // heads
    scale = head_dim ** (-0.5)
    BW = B * r1 * r2

    xw = x.reshape(B, C, r1, Wh, r2, Ww)
    xw = jnp.transpose(xw, (0, 2, 4, 3, 5, 1)).reshape(BW, N, C)

    qkv = xw @ params["w_qkv"] + params["b_qkv"][0]
    q, k, v = jnp.split(qkv, 3, axis=2)
    q = q * scale
    q, k, v = [t.reshape(BW, N, heads, head_dim).transpose(0, 2, 1, 3) for t in (q, k, v)]

    attn = jnp.einsum("bhmc,bhnc->bhmn", q, k)
    rpi = params["relative_position_index"]
    bias = params["relative_position_bias_table"][rpi.reshape(-1)].reshape(N, N, heads)
    bias = jnp.transpose(bias, (2, 0, 1))
    attn = attn + bias[None]
    attn = jax.nn.softmax(attn, axis=3)

    o = jnp.einsum("bhmn,bhnc->bhmc", attn, v)
    o = o.transpose(0, 2, 1, 3).reshape(BW, N, C)
    o = o @ params["w_out"] + params["b_out"][0]

    o = o.reshape(B, r1, r2, Wh, Ww, C)
    o = jnp.transpose(o, (0, 5, 1, 3, 2, 4)).reshape(B, C, H, W)
    return o


if __name__ == "__main__":
    dim = 32
    heads = 2
    window_size = (4, 4)
    B, H, W = 2, 8, 8

    key = jax.random.PRNGKey(0)
    kx, kp = jax.random.split(key)
    x = jax.random.normal(kx, (B, dim, H, W), jnp.float32)
    params = make_params(kp, dim, heads, window_size)

    ref = jax.block_until_ready(
        local_attention_ref(x, params, heads=heads, window_size=window_size))

    # f32 path: exact softmax division, tight tolerance against the reference.
    out_f32, _, _ = local_attention(x, params, heads=heads, window_size=window_size,
                                    compute_dtype=jnp.float32)
    out_f32 = jax.block_until_ready(out_f32)
    np.testing.assert_allclose(np.asarray(out_f32), np.asarray(ref), rtol=1e-5, atol=1e-5)

    # bf16 fast path (v6e/v7x MXU peak): bf16 matmul inputs, f32 accum/softmax,
    # approximate EUP reciprocal -> looser tolerance.
    out_bf16, _, _ = local_attention(x, params, heads=heads, window_size=window_size,
                                     compute_dtype=jnp.bfloat16)
    out_bf16 = jax.block_until_ready(out_bf16)
    np.testing.assert_allclose(np.asarray(out_bf16), np.asarray(ref), rtol=5e-2, atol=5e-3)

    print("KERNEL_OK")
</pallas_src>

<mosaic_0001>
module attributes {stable_mosaic.version = 11 : i64} {
  func.func @_local_attn_kernel(%arg0: i32, %arg1: memref<64x32xf32, #tpu.memory_space<vmem>>, %arg2: memref<32x96xf32, #tpu.memory_space<vmem>>, %arg3: memref<1x96xf32, #tpu.memory_space<vmem>>, %arg4: memref<2x16x16xf32, #tpu.memory_space<vmem>>, %arg5: memref<32x32xf32, #tpu.memory_space<vmem>>, %arg6: memref<1x32xf32, #tpu.memory_space<vmem>>, %arg7: memref<64x32xf32, #tpu.memory_space<vmem>>) attributes {dimension_semantics = [#tpu.dimension_semantics<parallel>], iteration_bounds = array<i64: 2>, scalar_prefetch = 0 : i64, scratch_operands = 0 : i64, tpu.core_type = #tpu.core_type<tc>, window_params = [{transform_indices = @transform_0, window_bounds = array<i64: 64, 32>}, {pipeline_mode = #tpu.pipeline_mode<synchronous>, transform_indices = @transform_1, window_bounds = array<i64: 32, 96>}, {pipeline_mode = #tpu.pipeline_mode<synchronous>, transform_indices = @transform_2, window_bounds = array<i64: 1, 96>}, {pipeline_mode = #tpu.pipeline_mode<synchronous>, transform_indices = @transform_3, window_bounds = array<i64: 2, 16, 16>}, {pipeline_mode = #tpu.pipeline_mode<synchronous>, transform_indices = @transform_4, window_bounds = array<i64: 32, 32>}, {pipeline_mode = #tpu.pipeline_mode<synchronous>, transform_indices = @transform_5, window_bounds = array<i64: 1, 32>}, {transform_indices = @transform_6, window_bounds = array<i64: 64, 32>}]} {
    %c0 = arith.constant 0 : index
    %c0_0 = arith.constant 0 : index
    %0 = vector.load %arg1[%c0, %c0_0] : memref<64x32xf32, #tpu.memory_space<vmem>>, vector<64x32xf32>
    %c0_1 = arith.constant 0 : index
    %c0_2 = arith.constant 0 : index
    %1 = vector.load %arg2[%c0_1, %c0_2] : memref<32x96xf32, #tpu.memory_space<vmem>>, vector<32x96xf32>
    %cst = arith.constant dense<0.000000e+00> : vector<64x96xf32>
    %2 = tpu.matmul %0, %1, %cst {dimension_numbers = #tpu.dot_dimension_numbers<[1], [0], [0], [1], [0, 0, 1, 1], [], []>} : vector<64x32xf32>, vector<32x96xf32>, vector<64x96xf32> -> vector<64x96xf32>
    %c0_3 = arith.constant 0 : index
    %c0_4 = arith.constant 0 : index
    %3 = vector.load %arg3[%c0_3, %c0_4] : memref<1x96xf32, #tpu.memory_space<vmem>>, vector<1x96xf32>
    %4 = vector.broadcast %3 : vector<1x96xf32> to vector<64x96xf32>
    %5 = arith.addf %2, %4 : vector<64x96xf32>
    %6 = vector.extract_strided_slice %5 {offsets = [0, 0], sizes = [64, 32], strides = [1, 1]} : vector<64x96xf32> to vector<64x32xf32>
    %7 = vector.shape_cast %6 : vector<64x32xf32> to vector<4x16x32xf32>
    %8 = vector.extract_strided_slice %5 {offsets = [0, 32], sizes = [64, 32], strides = [1, 1]} : vector<64x96xf32> to vector<64x32xf32>
    %9 = vector.shape_cast %8 : vector<64x32xf32> to vector<4x16x32xf32>
    %10 = vector.extract_strided_slice %5 {offsets = [0, 64], sizes = [64, 32], strides = [1, 1]} : vector<64x96xf32> to vector<64x32xf32>
    %11 = vector.shape_cast %10 : vector<64x32xf32> to vector<4x16x32xf32>
    %12 = vector.extract_strided_slice %7 {offsets = [0, 0, 0], sizes = [4, 16, 16], strides = [1, 1, 1]} : vector<4x16x32xf32> to vector<4x16x16xf32>
    %13 = vector.extract_strided_slice %9 {offsets = [0, 0, 0], sizes = [4, 16, 16], strides = [1, 1, 1]} : vector<4x16x32xf32> to vector<4x16x16xf32>
    %14 = vector.extract_strided_slice %11 {offsets = [0, 0, 0], sizes = [4, 16, 16], strides = [1, 1, 1]} : vector<4x16x32xf32> to vector<4x16x16xf32>
    "tpu.trace_start"() <{level = 10 : i32, message = "bqd,bkd->bqk"}> : () -> ()
    %cst_5 = arith.constant dense<0.000000e+00> : vector<4x16x16xf32>
    %15 = tpu.matmul %12, %13, %cst_5 {dimension_numbers = #tpu.dot_dimension_numbers<[2], [2], [1], [1], [0, 0, 0, 1, 1, 1], [0], [0]>} : vector<4x16x16xf32>, vector<4x16x16xf32>, vector<4x16x16xf32> -> vector<4x16x16xf32>
    "tpu.trace_stop"() : () -> ()
    %c0_6 = arith.constant 0 : index
    %c0_7 = arith.constant 0 : index
    %c0_8 = arith.constant 0 : index
    %16 = vector.load %arg4[%c0_6, %c0_7, %c0_8] : memref<2x16x16xf32, #tpu.memory_space<vmem>>, vector<1x16x16xf32>
    %17 = vector.shape_cast %16 : vector<1x16x16xf32> to vector<16x16xf32>
    %18 = vector.shape_cast %17 : vector<16x16xf32> to vector<1x16x16xf32>
    %19 = vector.broadcast %18 : vector<1x16x16xf32> to vector<4x16x16xf32>
    %20 = arith.addf %15, %19 : vector<4x16x16xf32>
    %cst_9 = arith.constant dense<0xFF800000> : vector<4x16xf32>
    %21 = vector.multi_reduction <maximumf>, %20, %cst_9 [2] : vector<4x16x16xf32> to vector<4x16xf32>
    %22 = vector.shape_cast %21 : vector<4x16xf32> to vector<4x16x1xf32>
    %23 = vector.broadcast %22 : vector<4x16x1xf32> to vector<4x16x16xf32>
    %24 = arith.subf %20, %23 : vector<4x16x16xf32>
    %25 = math.exp %24 : vector<4x16x16xf32>
    %cst_10 = arith.constant dense<0.000000e+00> : vector<4x16xf32>
    %26 = vector.multi_reduction <add>, %25, %cst_10 [2] : vector<4x16x16xf32> to vector<4x16xf32>
    %27 = vector.shape_cast %26 : vector<4x16xf32> to vector<4x16x1xf32>
    %28 = vector.broadcast %27 : vector<4x16x1xf32> to vector<4x16x16xf32>
    %29 = arith.divf %25, %28 : vector<4x16x16xf32>
    "tpu.trace_start"() <{level = 10 : i32, message = "bqk,bkd->bqd"}> : () -> ()
    %cst_11 = arith.constant dense<0.000000e+00> : vector<4x16x16xf32>
    %30 = tpu.matmul %29, %14, %cst_11 {dimension_numbers = #tpu.dot_dimension_numbers<[2], [1], [1], [2], [0, 0, 0, 1, 1, 2], [0], [0]>} : vector<4x16x16xf32>, vector<4x16x16xf32>, vector<4x16x16xf32> -> vector<4x16x16xf32>
    "tpu.trace_stop"() : () -> ()
    %31 = vector.shape_cast %30 : vector<4x16x16xf32> to vector<64x16xf32>
    %32 = vector.extract_strided_slice %7 {offsets = [0, 0, 16], sizes = [4, 16, 16], strides = [1, 1, 1]} : vector<4x16x32xf32> to vector<4x16x16xf32>
    %33 = vector.extract_strided_slice %9 {offsets = [0, 0, 16], sizes = [4, 16, 16], strides = [1, 1, 1]} : vector<4x16x32xf32> to vector<4x16x16xf32>
    %34 = vector.extract_strided_slice %11 {offsets = [0, 0, 16], sizes = [4, 16, 16], strides = [1, 1, 1]} : vector<4x16x32xf32> to vector<4x16x16xf32>
    "tpu.trace_start"() <{level = 10 : i32, message = "bqd,bkd->bqk"}> : () -> ()
    %cst_12 = arith.constant dense<0.000000e+00> : vector<4x16x16xf32>
    %35 = tpu.matmul %32, %33, %cst_12 {dimension_numbers = #tpu.dot_dimension_numbers<[2], [2], [1], [1], [0, 0, 0, 1, 1, 1], [0], [0]>} : vector<4x16x16xf32>, vector<4x16x16xf32>, vector<4x16x16xf32> -> vector<4x16x16xf32>
    "tpu.trace_stop"() : () -> ()
    %c1 = arith.constant 1 : index
    %c0_13 = arith.constant 0 : index
    %c0_14 = arith.constant 0 : index
    %36 = vector.load %arg4[%c1, %c0_13, %c0_14] : memref<2x16x16xf32, #tpu.memory_space<vmem>>, vector<1x16x16xf32>
    %37 = vector.shape_cast %36 : vector<1x16x16xf32> to vector<16x16xf32>
    %38 = vector.shape_cast %37 : vector<16x16xf32> to vector<1x16x16xf32>
    %39 = vector.broadcast %38 : vector<1x16x16xf32> to vector<4x16x16xf32>
    %40 = arith.addf %35, %39 : vector<4x16x16xf32>
    %cst_15 = arith.constant dense<0xFF800000> : vector<4x16xf32>
    %41 = vector.multi_reduction <maximumf>, %40, %cst_15 [2] : vector<4x16x16xf32> to vector<4x16xf32>
    %42 = vector.shape_cast %41 : vector<4x16xf32> to vector<4x16x1xf32>
    %43 = vector.broadcast %42 : vector<4x16x1xf32> to vector<4x16x16xf32>
    %44 = arith.subf %40, %43 : vector<4x16x16xf32>
    %45 = math.exp %44 : vector<4x16x16xf32>
    %cst_16 = arith.constant dense<0.000000e+00> : vector<4x16xf32>
    %46 = vector.multi_reduction <add>, %45, %cst_16 [2] : vector<4x16x16xf32> to vector<4x16xf32>
    %47 = vector.shape_cast %46 : vector<4x16xf32> to vector<4x16x1xf32>
    %48 = vector.broadcast %47 : vector<4x16x1xf32> to vector<4x16x16xf32>
    %49 = arith.divf %45, %48 : vector<4x16x16xf32>
    "tpu.trace_start"() <{level = 10 : i32, message = "bqk,bkd->bqd"}> : () -> ()
    %cst_17 = arith.constant dense<0.000000e+00> : vector<4x16x16xf32>
    %50 = tpu.matmul %49, %34, %cst_17 {dimension_numbers = #tpu.dot_dimension_numbers<[2], [1], [1], [2], [0, 0, 0, 1, 1, 2], [0], [0]>} : vector<4x16x16xf32>, vector<4x16x16xf32>, vector<4x16x16xf32> -> vector<4x16x16xf32>
    "tpu.trace_stop"() : () -> ()
    %51 = vector.shape_cast %50 : vector<4x16x16xf32> to vector<64x16xf32>
    %52 = tpu.concatenate %31, %51 in 1 : vector<64x16xf32>, vector<64x16xf32> -> vector<64x32xf32>
    %c0_18 = arith.constant 0 : index
    %c0_19 = arith.constant 0 : index
    %53 = vector.load %arg5[%c0_18, %c0_19] : memref<32x32xf32, #tpu.memory_space<vmem>>, vector<32x32xf32>
    %cst_20 = arith.constant dense<0.000000e+00> : vector<64x32xf32>
    %54 = tpu.matmul %52, %53, %cst_20 {dimension_numbers = #tpu.dot_dimension_numbers<[1], [0], [0], [1], [0, 0, 1, 1], [], []>} : vector<64x32xf32>, vector<32x32xf32>, vector<64x32xf32> -> vector<64x32xf32>
    %c0_21 = arith.constant 0 : index
    %c0_22 = arith.constant 0 : index
    %55 = vector.load %arg6[%c0_21, %c0_22] : memref<1x32xf32, #tpu.memory_space<vmem>>, vector<1x32xf32>
    %56 = vector.broadcast %55 : vector<1x32xf32> to vector<64x32xf32>
    %57 = arith.addf %54, %56 : vector<64x32xf32>
    %c0_23 = arith.constant 0 : index
    %c0_24 = arith.constant 0 : index
    %58 = vector.load %arg7[%c0_23, %c0_24] : memref<64x32xf32, #tpu.memory_space<vmem>>, vector<64x32xf32>
    tpu.vector_store %arg7[%c0_23, %c0_24], %57 {strides = array<i32>} : memref<64x32xf32, #tpu.memory_space<vmem>>, vector<64x32xf32>,
    return
  }
  func.func @transform_0(%arg0: i32) -> (i32, i32) {
    %c0_i32 = arith.constant 0 : i32
    %c0_i32_0 = arith.constant 0 : i32
    return %arg0, %c0_i32 : i32, i32
  }
  func.func @transform_1(%arg0: i32) -> (i32, i32) {
    %c0_i32 = arith.constant 0 : i32
    %c0_i32_0 = arith.constant 0 : i32
    %c0_i32_1 = arith.constant 0 : i32
    return %c0_i32, %c0_i32_0 : i32, i32
  }
  func.func @transform_2(%arg0: i32) -> (i32, i32) {
    %c0_i32 = arith.constant 0 : i32
    %c0_i32_0 = arith.constant 0 : i32
    %c0_i32_1 = arith.constant 0 : i32
    return %c0_i32, %c0_i32_0 : i32, i32
  }
  func.func @transform_3(%arg0: i32) -> (i32, i32, i32) {
    %c0_i32 = arith.constant 0 : i32
    %c0_i32_0 = arith.constant 0 : i32
    %c0_i32_1 = arith.constant 0 : i32
    %c0_i32_2 = arith.constant 0 : i32
    return %c0_i32, %c0_i32_0, %c0_i32_1 : i32, i32, i32
  }
  func.func @transform_4(%arg0: i32) -> (i32, i32) {
    %c0_i32 = arith.constant 0 : i32
    %c0_i32_0 = arith.constant 0 : i32
    %c0_i32_1 = arith.constant 0 : i32
    return %c0_i32, %c0_i32_0 : i32, i32
  }
  func.func @transform_5(%arg0: i32) -> (i32, i32) {
    %c0_i32 = arith.constant 0 : i32
    %c0_i32_0 = arith.constant 0 : i32
    %c0_i32_1 = arith.constant 0 : i32
    return %c0_i32, %c0_i32_0 : i32, i32
  }
  func.func @transform_6(%arg0: i32) -> (i32, i32) {
    %c0_i32 = arith.constant 0 : i32
    %c0_i32_0 = arith.constant 0 : i32
    return %arg0, %c0_i32 : i32, i32
  }
}

</mosaic_0001>

<bundles_post_ra>
// kernel: tpu_custom_call.1
= control target key start
LH: loop header
LB: loop body
LE: loop exit
PB: predicated region body
PF: predicated region fallthrough
CT: control target
= control target key end

     0   :  { %s2700_s21 = smov 0   ;;  %s3069_s0 = inlined_call_operand.vmem [shape: f32[128,32], index: 0, kind: input, shape index: {}]   ;;  %s3070_s1 = inlined_call_operand.vmem [shape: f32[32,96], index: 1, kind: input, shape index: {}]   ;;  %s3071_s2 = inlined_call_operand.vmem [shape: f32[1,96], index: 2, kind: input, shape index: {}]   ;;  %s3072_s3 = inlined_call_operand.vmem [shape: f32[2,16,16], index: 3, kind: input, shape index: {}]   ;;  %s3073_s4 = inlined_call_operand.vmem [shape: f32[32,32], index: 4, kind: input, shape index: {}]   ;;  %s3074_s5 = inlined_call_operand.vmem [shape: f32[1,32], index: 5, kind: input, shape index: {}]   ;;  %s3075_s6 = inlined_call_operand.vmem [shape: f32[128,32], index: 6, kind: output, shape index: {}]  }
   0x1 LB: > { %s2246_s22 = sadd.s32 4294967295, %s2657_s21   ;;  %p2250_p0 = scmp.ge.s32.totalorder %s2657_s21, 1  ;;  %s2657_s21 = sphi %s2700_s21, %s16_s21  }
   0x2   : > { %p213_p1 = scmp.lt.s32.totalorder %s2657_s21, 3 }
   0x4   : > { %p214_p2 = pnand %p2250_p0, %p213_p1 }
   0x5   : > { %s2251_s27 = sshll.u32 (!%p214_p2), %s2246_s22, 3  ;;  %s2659_s14 = smov (!%p214_p2), 96  }
   0x6   : > { %217 = sbr.rel (%p214_p2) target bundleno = 1979 (0x7bb), region = 44  ;;  %p244_p3 = scmp.lt.s32.totalorder (!%p214_p2), %s2251_s27, 15 }
   0x7   : > { %s2660_s15 = smov (!%p214_p2), 64   ;;  %s2661_s20 = smov (!%p214_p2), 80  }
   0x8   : > { %s2662_s22 = smov (!%p214_p2), 112   ;;  %s2663_s28 = smov (!%p214_p2), 48  }
   0xb   : > { %v266_v0 = vld [vmem:[%s3070_s1 + $0x18] sm:$0xff]  ;;  %v265_v1 = vld [vmem:[%s3070_s1 + $0x10] sm:$0xff]  ;;  %v264_v2 = vld [vmem:[%s3070_s1 + $0x8] sm:$0xff]  ;;  %s3077_s27 = smov (!%p244_p3, %s2251_s27), 15  ;;  %vm274_vm0 = vcmask 261120   ;;  %vm412_vm1 = vcmask 130048  }
   0xc   : > { %2413 = vmatprep.subr.mxu0 %v266_v0  ;;  %2565 = vmatprep.subr.mxu1 %v266_v0  ;;  %v263_v3 = vld [vmem:[%s3070_s1] sm:$0xff]  ;;  %s2252_s8 = sshll.u32 %s3077_s27, 3  ;;  %v405_v38 = vld [vmem:[%s3072_s3 + $0x8] sm:$0xff] }
   0xd   : > { %2414 = vmatpush3.msra.mxu0 %v266_v0  ;;  %2569 = vmatpush3.msra.mxu1 %v266_v0  ;;  %s247_s11 = scalar_lea.vmem %s3069_s0, %s2252_s8  ;;  %v2255_v12 = vld [vmem:[%s3071_s2] ss:$0 sm:$0xff]  ;;  %s253_s19 = scalar_lea.vmem %s3075_s6, %s2252_s8 }
   0xe   : > { %2415 = vmatprep.subr.mxu0 %v265_v1  ;;  %2566 = vmatprep.subr.mxu1 %v265_v1  ;;  %v255_v4 = vld [vmem:[%s247_s11] sm:$0xff]  ;;  %v256_v5 = vld [vmem:[%s247_s11 + $0x8] sm:$0xff]  ;;  %v257_v6 = vld [vmem:[%s247_s11 + $0x10] sm:$0xff] }
   0xf   : > { %2416 = vmatpush3.msra.mxu0 %v265_v1  ;;  %2570 = vmatpush3.msra.mxu1 %v265_v1  ;;  %v259_v7 = vld [vmem:[%s247_s11 + $0x20] sm:$0xff]  ;;  %v260_v8 = vld [vmem:[%s247_s11 + $0x28] sm:$0xff]  ;;  %v261_v9 = vld [vmem:[%s247_s11 + $0x30] sm:$0xff] }
  0x10   : > { %2417 = vmatprep.subr.mxu0 %v264_v2  ;;  %2567 = vmatprep.subr.mxu1 %v264_v2  ;;  %v258_v10 = vld [vmem:[%s247_s11 + $0x18] sm:$0xff]  ;;  %v404_v44 = vld [vmem:[%s3072_s3] sm:$0xff] }
  0x11   : > { %2418 = vmatpush3.msra.mxu0 %v264_v2  ;;  %2571 = vmatpush3.msra.mxu1 %v264_v2  ;;  %v262_v11 = vld [vmem:[%s247_s11 + $0x38] sm:$0xff] }
  0x12   : > { %2419 = vmatprep.subr.mxu0 %v263_v3  ;;  %2568 = vmatprep.subr.mxu1 %v263_v3 }
  0x13   : > { %2420 = vmatpush3.msra.mxu0 %v263_v3  ;;  %2421 = vmatprep.mubr.msk.f32.mxu0 %vm274_vm0, %v255_v4 }
  0x14   : > { %2422 = vmatmul.mubr.msk.f32.vlgmr.msra.gmra.mxu0 %vm274_vm0, %v256_v5  ;;  %2572 = vmatpush3.msra.mxu1 %v263_v3 }
  0x15   : > { %2424 = vmatprep.mubr.msk.f32.mxu0 %vm274_vm0, %v257_v6  ;;  %2427 = vmatprep.mubr.msk.f32.mxu1 %vm274_vm0, %v259_v7 }
  0x16   : > { %2428 = vmatmul.mubr.msk.f32.vlgmr.msra.gmra.mxu1 %vm274_vm0, %v260_v8 }
  0x17   : > { %2430 = vmatprep.mubr.msk.f32.mxu1 %vm274_vm0, %v261_v9 }
  0x18   : > { %2425 = vmatmul.mubr.msk.f32.gmra.mxu0 %vm274_vm0, %v258_v10 }
  0x1a   : > { %2431 = vmatmul.mubr.msk.f32.gmra.mxu1 %vm274_vm0, %v262_v11 }
  0xd4   : > { %v2423_v13 = vpop.f32.mrf.mxu0 }
  0xd5   : > { %v2739_v14 = vadd.f32 %v2423_v13, %v2255_v12 }
  0xd6   : > { %v365_v15 = vpop.f32.mrf.mxu0  ;;  %v2429_v16 = vpop.f32.mrf.mxu1 }
  0xd7   : > { %v2741_v17 = vadd.f32 %v2255_v12, %v365_v15  ;;  %410 = vrot.lane.b32.xlu0 %v2739_v14, %s2659_s14  ;;  %v2754_v24 = vadd.f32 %v2429_v16, %v2255_v12 }
  0xd8   : > { %v2426_v18 = vpop.f32.mrf.mxu0  ;;  %v385_v19 = vpop.f32.mrf.mxu1 }
  0xd9   : > { %v2744_v20 = vadd.f32 %v2426_v18, %v2255_v12  ;;  %2437 = vmatprep.mubr.msk.f32.mxu1 %vm412_vm1, %v2741_v17  ;;  %v2748_v22 = vadd.f32 %v2255_v12, %v385_v19 }
  0xda   : > { %v375_v21 = vpop.f32.mrf.mxu0  ;;  %v2432_v25 = vpop.f32.mrf.mxu1 }
  0xdb   : > { %500 = vrot.lane.b32.xlu1 %v2744_v20, %s2659_s14  ;;  %408 = vrot.lane.b32.xlu0 %v2741_v17, %s2659_s14  ;;  %v2752_v23 = vadd.f32 %v2255_v12, %v375_v21  ;;  %v2760_v26 = vadd.f32 %v2432_v25, %v2255_v12 }
  0xdc   : > { %2451 = vmatprep.mubr.msk.f32.mxu0 %vm412_vm1, %v2748_v22  ;;  %v395_v27 = vpop.f32.mrf.mxu1 }
  0xdd   : > { %v2763_v28 = vadd.f32 %v2255_v12, %v395_v27 }
  0xdf   : > { %498 = vrot.lane.b32.xlu1 %v2752_v23, %s2659_s14  ;;  %589 = vrot.lane.b32.xlu0 %v2754_v24, %s2659_s14 }
  0xe3   : > { %587 = vrot.lane.b32.xlu1 %v2748_v22, %s2659_s14  ;;  %678 = vrot.lane.b32.xlu0 %v2760_v26, %s2659_s14 }
  0xe7   : > { %676 = vrot.lane.b32.xlu1 %v2763_v28, %s2659_s14  ;;  %s2664_s14 = smov 16  }
  0xeb   : > { %853 = vrot.lane.b32.xlu1 %v2739_v14, %s2660_s15 }
 0x149   : > { %v411_v29 = vpop.permute.xlu0 %410 }
 0x14a   : > { %2433 = vmatprep.subr.msk.mxu1 %vm412_vm1, %v411_v29 }
 0x14b   : > { %2434 = vmatpush3.xpose.msk.msra.mxu1 %vm412_vm1, %v411_v29 }
 0x14d   : > { %v501_v30 = vpop.permute.xlu1 %500  ;;  %v409_v31 = vpop.permute.xlu0 %408 }
 0x14e   : > { %2435 = vmatprep.subr.msk.mxu1 %vm412_vm1, %v409_v31 }
 0x14f   : > { %2436 = vmatpush3.xpose.msk.msra.mxu1 %vm412_vm1, %v409_v31 }
 0x150   : > { %2440 = vmatprep.subr.msk.mxu1 %vm412_vm1, %v501_v30 }
 0x151   : > { %v499_v32 = vpop.permute.xlu1 %498  ;;  %v590_v33 = vpop.permute.xlu0 %589 }
 0x152   : > { %2438 = vmatmul.mubr.msk.f32.vlgmr.msra.gmra.mxu1 %vm412_vm1, %v2739_v14  ;;  %2447 = vmatprep.subr.msk.mxu0 %vm412_vm1, %v590_v33 }
 0x153   : > { %2441 = vmatpush3.xpose.msk.msra.mxu1 %vm412_vm1, %v501_v30  ;;  %2444 = vmatprep.mubr.msk.f32.mxu1 %vm412_vm1, %v2752_v23 }
 0x154   : > { %2448 = vmatpush3.xpose.msk.msra.mxu0 %vm412_vm1, %v590_v33  ;;  %2442 = vmatprep.subr.msk.mxu1 %vm412_vm1, %v499_v32 }
 0x155   : > { %v588_v34 = vpop.permute.xlu1 %587  ;;  %v679_v35 = vpop.permute.xlu0 %678 }
 0x156   : > { %2449 = vmatprep.subr.msk.mxu0 %vm412_vm1, %v588_v34 }
 0x157   : > { %2443 = vmatpush3.xpose.msk.msra.mxu1 %vm412_vm1, %v499_v32 }
 0x158   : > { %2450 = vmatpush3.xpose.msk.msra.mxu0 %vm412_vm1, %v588_v34  ;;  %2454 = vmatprep.subr.msk.mxu1 %vm412_vm1, %v679_v35 }
 0x159   : > { %v677_v36 = vpop.permute.xlu1 %676 }
 0x15a   : > { %2445 = vmatmul.mubr.msk.f32.vlgmr.msra.gmra.mxu1 %vm412_vm1, %v2744_v20 }
 0x15b   : > { %2452 = vmatmul.mubr.msk.f32.vlgmr.msra.gmra.mxu0 %vm412_vm1, %v2754_v24  ;;  %2455 = vmatpush3.xpose.msk.msra.mxu1 %vm412_vm1, %v679_v35 }
 0x15c   : > { %2458 = vmatprep.mubr.msk.f32.mxu1 %vm412_vm1, %v2763_v28  ;;  %2456 = vmatprep.subr.msk.mxu1 %vm412_vm1, %v677_v36 }
 0x15d   : > { %v854_v37 = vpop.permute.xlu1 %853 }
 0x15e   : > { %2461 = vmatprep.subr.mxu0 %v854_v37 }
 0x15f   : > { %2457 = vmatpush3.xpose.msk.msra.mxu1 %vm412_vm1, %v677_v36  ;;  %2462 = vmatpush3.msra.mxu0 %v854_v37 }
 0x162   : > { %2459 = vmatmul.mubr.msk.f32.vlgmr.msra.gmra.mxu1 %vm412_vm1, %v2760_v26 }
 0x212   : > { %v2439_v39 = vpop.f32.mrf.mxu1 }
 0x213   : > { %v493_v40 = vadd.f32 %v2439_v39, %v405_v38 }
 0x214   : > { %v487_v42 = vpop.f32.mrf.mxu1 }
 0x215   : > { %v766_v41 = vsel %vm412_vm1, %v493_v40, -inf  ;;  %v488_v49 = vadd.f32 %v487_v42, %v404_v44 }
 0x216   : > { %767 = vmax.xlane.f32.xlu1 %v766_v41 }
 0x217   : > { %v763_v53 = vsel %vm412_vm1, %v488_v49, -inf }
 0x21a   : > { %v2446_v43 = vpop.f32.mrf.mxu1 }
 0x21b   : > { %v582_v45 = vadd.f32 %v2446_v43, %v405_v38  ;;  %v2453_v46 = vpop.f32.mrf.mxu0 }
 0x21c   : > { %v671_v47 = vadd.f32 %v2453_v46, %v405_v38  ;;  %v576_v54 = vpop.f32.mrf.mxu1 }
 0x21d   : > { %v772_v48 = vsel %vm412_vm1, %v582_v45, -inf  ;;  %v665_v51 = vpop.f32.mrf.mxu0  ;;  %v577_v55 = vadd.f32 %v576_v54, %v404_v44 }
 0x21e   : > { %v778_v50 = vsel %vm412_vm1, %v671_v47, -inf  ;;  %773 = vmax.xlane.f32.xlu1 %v772_v48  ;;  %v666_v52 = vadd.f32 %v665_v51, %v404_v44 }
 0x21f   : > { %779 = vmax.xlane.f32.xlu0 %v778_v50  ;;  %v769_v59 = vsel %vm412_vm1, %v577_v55, -inf }
 0x220   : > { %v775_v56 = vsel %vm412_vm1, %v666_v52, -inf }
 0x222   : > { %v2460_v57 = vpop.f32.mrf.mxu1 }
 0x223   : > { %764 = vmax.xlane.f32.xlu0 %v763_v53  ;;  %v760_v58 = vadd.f32 %v2460_v57, %v405_v38 }
 0x224   : > { %v754_v61 = vpop.f32.mrf.mxu1 }
 0x225   : > { %v784_v60 = vsel %vm412_vm1, %v760_v58, -inf  ;;  %v2838_v62 = vadd.f32 %v754_v61, %v404_v44 }
 0x227   : > { %776 = vmax.xlane.f32.xlu0 %v775_v56  ;;  %v781_v63 = vsel %vm412_vm1, %v2838_v62, -inf }
 0x22b   : > { %770 = vmax.xlane.f32.xlu0 %v769_v59 }
 0x22f   : > { %785 = vmax.xlane.f32.xlu0 %v784_v60  ;;  %940 = vrot.lane.b32.xlu1 %v2744_v20, %s2660_s15 }
 0x233   : > { %1027 = vrot.lane.b32.xlu1 %v2754_v24, %s2660_s15 }
 0x237   : > { %1025 = vrot.lane.b32.xlu1 %v2748_v22, %s2660_s15 }
 0x23b   : > { %1208 = vrot.lane.b32.xlu1 %v2739_v14, %s2661_s20 }
 0x23f   : > { %1206 = vrot.lane.b32.xlu1 %v2741_v17, %s2661_s20 }
 0x243   : > { %1202 = vrot.lane.b32.xlu1 %v2741_v17, %s2662_s22 }
 0x245   : > { %851 = vrot.lane.b32.xlu0 %v2741_v17, %s2660_s15 }
 0x247   : > { %1297 = vrot.lane.b32.xlu1 %v2752_v23, %s2661_s20 }
 0x249   : > { %938 = vrot.lane.b32.xlu0 %v2752_v23, %s2660_s15 }
 0x24d   : > { %1114 = vrot.lane.b32.xlu0 %v2760_v26, %s2660_s15 }
 0x251   : > { %1112 = vrot.lane.b32.xlu0 %v2763_v28, %s2660_s15 }
 0x255   : > { %1299 = vrot.lane.b32.xlu0 %v2744_v20, %s2661_s20 }
 0x259   : > { %1204 = vrot.lane.b32.xlu0 %v2739_v14, %s2662_s22 }
 0x25d   : > { %1390 = vrot.lane.b32.xlu0 %v2754_v24, %s2661_s20 }
 0x26b   : > { %782 = vmax.xlane.f32.xlu1 %v781_v63 }
 0x27c   : > { %1293 = vrot.lane.b32.xlu1 %v2752_v23, %s2662_s22 }
 0x29f   : > { %v768_v0 = vpop.xlane.xlu1 %767 }
 0x2a0   : > { %v788_v1 = vsub.f32 %v493_v40, %v768_v0 }
 0x2a2   : > { %v797_v2 = vmul.f32 1.442695, %v788_v1 }
 0x2a4   : > { %2587 = vpow2.f32 %v797_v2 }
 0x2a7   : > { %v774_v3 = vpop.xlane.xlu1 %773 }
 0x2a8   : > { %v780_v4 = vpop.xlane.xlu0 %779  ;;  %v790_v7 = vsub.f32 %v582_v45, %v774_v3 }
 0x2a9   : > { %v792_v5 = vsub.f32 %v671_v47, %v780_v4 }
 0x2aa   : > { %v801_v11 = vmul.f32 1.442695, %v790_v7 }
 0x2ab   : > { %v805_v6 = vmul.f32 1.442695, %v792_v5  ;;  %v941_v8 = vpop.permute.xlu1 %940 }
 0x2ac   : > { %v765_v9 = vpop.xlane.xlu0 %764  ;;  %2468 = vmatprep.subr.mxu1 %v941_v8 }
 0x2ad   : > { %2589 = vpow2.f32 %v805_v6  ;;  %v787_v10 = vsub.f32 %v488_v49, %v765_v9  ;;  %2469 = vmatpush3.msra.mxu1 %v941_v8 }
 0x2af   : > { %v795_v12 = vmul.f32 1.442695, %v787_v10  ;;  %v2852_v36 = vpop.permute.xlu1 %1027 }
 0x2b0   : > { %v777_v13 = vpop.xlane.xlu0 %776 }
 0x2b1   : > { %v2844_v15 = vpop.eup %2587  ;;  %2591 = vpow2.f32 %v795_v12  ;;  %v791_v16 = vsub.f32 %v666_v52, %v777_v13 }
 0x2b2   : > { %v814_v18 = vsel %vm412_vm1, %v2844_v15, 0.0  ;;  %2593 = vpow2.f32 %v801_v11 }
 0x2b3   : > { %v803_v19 = vmul.f32 1.442695, %v791_v16  ;;  %815 = vadd.xlane.f32.xlu0 %v814_v18  ;;  %v1026_v48 = vpop.permute.xlu1 %1025 }
 0x2b4   : > { %v771_v21 = vpop.xlane.xlu0 %770 }
 0x2b5   : > { %2595 = vpow2.f32 %v803_v19  ;;  %v789_v25 = vsub.f32 %v577_v55, %v771_v21 }
 0x2b7   : > { %v799_v27 = vmul.f32 1.442695, %v789_v25  ;;  %v1209_v49 = vpop.permute.xlu1 %1208 }
 0x2b8   : > { %v786_v29 = vpop.xlane.xlu0 %785 }
 0x2b9   : > { %2597 = vpow2.f32 %v799_v27  ;;  %v794_v30 = vsub.f32 %v760_v58, %v786_v29 }
 0x2ba   : > { %v2848_v31 = vpop.eup %2589 }
 0x2bb   : > { %v809_v32 = vmul.f32 1.442695, %v794_v30  ;;  %v826_v33 = vsel %vm412_vm1, %v2848_v31, 0.0  ;;  %v1207_v50 = vpop.permute.xlu1 %1206 }
 0x2bc   : > { %827 = vadd.xlane.f32.xlu0 %v826_v33  ;;  %v852_v34 = vpop.permute.xlu0 %851 }
 0x2bd   : > { %2599 = vpow2.f32 %v809_v32  ;;  %2463 = vmatprep.subr.mxu0 %v852_v34 }
 0x2be   : > { %v2592_v35 = vpop.eup %2591  ;;  %2464 = vmatpush3.msra.mxu0 %v852_v34 }
 0x2bf   : > { %2475 = vmatprep.subr.mxu0 %v2852_v36  ;;  %v811_v37 = vsel %vm412_vm1, %v2592_v35, 0.0  ;;  %v2856_v38 = vpop.eup %2593  ;;  %v1203_v51 = vpop.permute.xlu1 %1202 }
 0x2c0   : > { %812 = vadd.xlane.f32.xlu1 %v811_v37  ;;  %v939_v39 = vpop.permute.xlu0 %938  ;;  %v820_v41 = vsel %vm412_vm1, %v2856_v38, 0.0 }
 0x2c1   : > { %2470 = vmatprep.subr.mxu1 %v939_v39 }
 0x2c2   : > { %v2596_v40 = vpop.eup %2595  ;;  %2471 = vmatpush3.msra.mxu1 %v939_v39 }
 0x2c3   : > { %v823_v42 = vsel %vm412_vm1, %v2596_v40, 0.0  ;;  %v2879_v52 = vpop.permute.xlu1 %1297 }
 0x2c4   : > { %821 = vadd.xlane.f32.xlu1 %v820_v41  ;;  %824 = vadd.xlane.f32.xlu0 %v823_v42  ;;  %v2861_v43 = vpop.permute.xlu0 %1114 }
 0x2c5   : > { %2482 = vmatprep.subr.mxu1 %v2861_v43 }
 0x2c6   : > { %v2598_v44 = vpop.eup %2597 }
 0x2c7   : > { %v817_v45 = vsel %vm412_vm1, %v2598_v44, 0.0 }
 0x2c8   : > { %818 = vadd.xlane.f32.xlu1 %v817_v45  ;;  %v1113_v58 = vpop.permute.xlu0 %1112  ;;  %v2288_v45 = vld [vmem:[%s3072_s3 + $0x10] sm:$0xff] }
 0x2ca   : > { %v2865_v46 = vpop.eup %2599 }
 0x2cb   : > { %v832_v47 = vsel %vm412_vm1, %v2865_v46, 0.0 }
 0x2cc   : > { %833 = vadd.xlane.f32.xlu0 %v832_v47  ;;  %v2892_v59 = vpop.permute.xlu0 %1299 }
 0x2d0   : > { %v1205_v60 = vpop.permute.xlu0 %1204 }
 0x2d4   : > { %v1391_v61 = vpop.permute.xlu0 %1390 }
 0x2d9   : > { %1388 = vrot.lane.b32.xlu1 %v2748_v22, %s2661_s20 }
 0x2e2   : > { %1295 = vrot.lane.b32.xlu0 %v2744_v20, %s2662_s22 }
 0x2e6   : > { %1481 = vrot.lane.b32.xlu0 %v2760_v26, %s2661_s20 }
 0x2ea   : > { %1386 = vrot.lane.b32.xlu0 %v2754_v24, %s2662_s22 }
 0x2ee   : > { %1475 = vrot.lane.b32.xlu0 %v2763_v28, %s2662_s22 }
 0x2f4   : > { %v783_v53 = vpop.xlane.xlu1 %782 }
 0x2f5   : > { %v793_v54 = vsub.f32 %v2838_v62, %v783_v53 }
 0x2f7   : > { %v807_v55 = vmul.f32 1.442695, %v793_v54 }
 0x2f8   : > { %v2894_v62 = vpop.permute.xlu1 %1293 }
 0x2f9   : > { %2601 = vpow2.f32 %v807_v55 }
 0x306   : > { %v2882_v56 = vpop.eup %2601 }
 0x307   : > { %v829_v57 = vsel %vm412_vm1, %v2882_v56, 0.0 }
 0x308   : > { %830 = vadd.xlane.f32.xlu1 %v829_v57 }
 0x319   : > { %1384 = vrot.lane.b32.xlu1 %v2748_v22, %s2662_s22 }
 0x31d   : > { %1479 = vrot.lane.b32.xlu1 %v2763_v28, %s2661_s20 }
 0x321   : > { %1477 = vrot.lane.b32.xlu1 %v2760_v26, %s2662_s22 }
 0x33c   : > { %v816_v63 = vpop.xlane.xlu0 %815 }
 0x33d   : > { %2603 = vrcp.f32 %v816_v63 }
 0x345   : > { %v828_v0 = vpop.xlane.xlu0 %827 }
 0x349   : > { %v813_v1 = vpop.xlane.xlu1 %812 }
 0x34a   : > { %2605 = vrcp.f32 %v813_v1  ;;  %v2604_v5 = vpop.eup %2603 }
 0x34b   : > { %2607 = vrcp.f32 %v828_v0  ;;  %v838_v8 = vmul.f32 %v2604_v5, %v2844_v15 }
 0x34d   : > { %v822_v2 = vpop.xlane.xlu1 %821  ;;  %v825_v3 = vpop.xlane.xlu0 %824 }
 0x34e   : > { %2609 = vrcp.f32 %v825_v3 }
 0x34f   : > { %2611 = vrcp.f32 %v822_v2 }
 0x351   : > { %v819_v4 = vpop.xlane.xlu1 %818 }
 0x352   : > { %2613 = vrcp.f32 %v819_v4 }
 0x355   : > { %v1389_v19 = vpop.permute.xlu1 %1388  ;;  %v834_v21 = vpop.xlane.xlu0 %833 }
 0x356   : > { %2615 = vrcp.f32 %v834_v21 }
 0x357   : > { %v2606_v6 = vpop.eup %2605 }
 0x358   : > { %v836_v7 = vmul.f32 %v2606_v6, %v2592_v35  ;;  %v2608_v9 = vpop.eup %2607 }
 0x359   : > { %v846_v13 = vmul.f32 %v2608_v9, %v2848_v31  ;;  %v1296_v25 = vpop.permute.xlu0 %1295 }
 0x35a   : > { %2465 = vmatprep.mubr.msk.f32.mxu0 %vm412_vm1, %v836_v7 }
 0x35b   : > { %2466 = vmatmul.mubr.msk.f32.vlgmr.msra.gmra.mxu0 %vm412_vm1, %v838_v8  ;;  %v2610_v10 = vpop.eup %2609 }
 0x35c   : > { %2476 = vmatpush3.msra.mxu0 %v2852_v36  ;;  %v844_v11 = vmul.f32 %v2610_v10, %v2596_v40  ;;  %v2612_v12 = vpop.eup %2611 }
 0x35d   : > { %2477 = vmatprep.subr.mxu0 %v1026_v48  ;;  %v842_v18 = vmul.f32 %v2612_v12, %v2856_v38  ;;  %v1482_v27 = vpop.permute.xlu0 %1481 }
 0x35e   : > { %2478 = vmatpush3.msra.mxu0 %v1026_v48  ;;  %2479 = vmatprep.mubr.msk.f32.mxu0 %vm412_vm1, %v844_v11 }
 0x35f   : > { %v2614_v16 = vpop.eup %2613  ;;  %2489 = vmatprep.subr.msk.mxu0 %vm412_vm1, %v1209_v49  ;;  %2480 = vmatmul.mubr.msk.f32.vlgmr.msra.gmra.mxu0 %vm412_vm1, %v846_v13 }
 0x360   : > { %v840_v15 = vmul.f32 %v2614_v16, %v2598_v44  ;;  %2490 = vmatpush3.xpose.msk.msra.mxu0 %vm412_vm1, %v1209_v49  ;;  %2493 = vmatprep.mubr.msk.f32.mxu0 %vm412_vm1, %v1203_v51 }
 0x361   : > { %2491 = vmatprep.subr.msk.mxu0 %vm412_vm1, %v1207_v50  ;;  %v1387_v31 = vpop.permute.xlu0 %1386 }
 0x362   : > { %2472 = vmatprep.mubr.msk.f32.mxu1 %vm412_vm1, %v840_v15 }
 0x363   : > { %2473 = vmatmul.mubr.msk.f32.vlgmr.msra.gmra.mxu1 %vm412_vm1, %v842_v18  ;;  %v2616_v32 = vpop.eup %2615 }
 0x364   : > { %2483 = vmatpush3.msra.mxu1 %v2861_v43  ;;  %2492 = vmatpush3.xpose.msk.msra.mxu0 %vm412_vm1, %v1207_v50  ;;  %v850_v35 = vmul.f32 %v2616_v32, %v2865_v46  ;;  %v2289_v43 = vld [vmem:[%s3072_s3 + $0x18] sm:$0xff] }
 0x365   : > { %2484 = vmatprep.subr.mxu1 %v1113_v58  ;;  %2503 = vmatprep.subr.msk.mxu0 %vm412_vm1, %v1391_v61  ;;  %v1476_v36 = vpop.permute.xlu0 %1475 }
 0x366   : > { %2485 = vmatpush3.msra.mxu1 %v1113_v58 }
 0x367   : > { %2496 = vmatprep.subr.msk.mxu1 %vm412_vm1, %v2892_v59  ;;  %2494 = vmatmul.mubr.msk.f32.vlgmr.msra.gmra.mxu0 %vm412_vm1, %v1205_v60 }
 0x368   : > { %2504 = vmatpush3.xpose.msk.msra.mxu0 %vm412_vm1, %v1391_v61 }
 0x369   : > { %2505 = vmatprep.subr.msk.mxu0 %vm412_vm1, %v1389_v19 }
 0x36c   : > { %2506 = vmatpush3.xpose.msk.msra.mxu0 %vm412_vm1, %v1389_v19 }
 0x391   : > { %v831_v29 = vpop.xlane.xlu1 %830 }
 0x392   : > { %2617 = vrcp.f32 %v831_v29 }
 0x395   : > { %v1385_v30 = vpop.permute.xlu1 %1384 }
 0x396   : > { %2507 = vmatprep.mubr.msk.f32.mxu0 %vm412_vm1, %v1385_v30 }
 0x397   : > { %2508 = vmatmul.mubr.msk.f32.vlgmr.msra.gmra.mxu0 %vm412_vm1, %v1387_v31 }
 0x399   : > { %v1480_v37 = vpop.permute.xlu1 %1479 }
 0x39d   : > { %v1478_v38 = vpop.permute.xlu1 %1477 }
 0x39f   : > { %v2618_v33 = vpop.eup %2617 }
 0x3a0   : > { %v848_v34 = vmul.f32 %v2618_v33, %v2882_v56 }
 0x3a2   : > { %2486 = vmatprep.mubr.msk.f32.mxu1 %vm412_vm1, %v848_v34 }
 0x3a3   : > { %2487 = vmatmul.mubr.msk.f32.vlgmr.msra.gmra.mxu1 %vm412_vm1, %v850_v35 }
 0x3a4   : > { %2497 = vmatpush3.xpose.msk.msra.mxu1 %vm412_vm1, %v2892_v59  ;;  %2500 = vmatprep.mubr.msk.f32.mxu1 %vm412_vm1, %v2894_v62 }
 0x3a5   : > { %2498 = vmatprep.subr.msk.mxu1 %vm412_vm1, %v2879_v52 }
 0x3a8   : > { %2499 = vmatpush3.xpose.msk.msra.mxu1 %vm412_vm1, %v2879_v52 }
 0x3a9   : > { %2510 = vmatprep.subr.msk.mxu1 %vm412_vm1, %v1482_v27 }
 0x3ab   : > { %2501 = vmatmul.mubr.msk.f32.vlgmr.msra.gmra.mxu1 %vm412_vm1, %v1296_v25 }
 0x3ac   : > { %2511 = vmatpush3.xpose.msk.msra.mxu1 %vm412_vm1, %v1482_v27  ;;  %2514 = vmatprep.mubr.msk.f32.mxu1 %vm412_vm1, %v1476_v36 }
 0x3ad   : > { %2512 = vmatprep.subr.msk.mxu1 %vm412_vm1, %v1480_v37 }
 0x3b0   : > { %2513 = vmatpush3.xpose.msk.msra.mxu1 %vm412_vm1, %v1480_v37 }
 0x3b3   : > { %2515 = vmatmul.mubr.msk.f32.vlgmr.msra.gmra.mxu1 %vm412_vm1, %v1478_v38 }
 0x41b   : > { %v2940_v39 = vpop.f32.mrf.mxu0 }
 0x41d   : > { %v2942_v40 = vpop.f32.mrf.mxu0 }
 0x41f   : > { %v2944_v41 = vpop.f32.mrf.mxu0 }
 0x421   : > { %v2946_v42 = vpop.f32.mrf.mxu0 }
 0x423   : > { %v2957_v55 = vpop.f32.mrf.mxu1 }
 0x425   : > { %v2959_v56 = vpop.f32.mrf.mxu1 }
 0x427   : > { %v2495_v44 = vpop.f32.mrf.mxu0 }
 0x428   : > { %v1290_v46 = vadd.f32 %v2495_v44, %v2289_v43 }
 0x429   : > { %v1284_v47 = vpop.f32.mrf.mxu0 }
 0x42a   : > { %v1285_v48 = vadd.f32 %v2288_v45, %v1284_v47  ;;  %v1569_v49 = vsel %vm412_vm1, %v1290_v46, -inf }
 0x42b   : > { %1570 = vmax.xlane.f32.xlu1 %v1569_v49 }
 0x42c   : > { %v1566_v50 = vsel %vm412_vm1, %v1285_v48, -inf }
 0x42d   : > { %1567 = vmax.xlane.f32.xlu0 %v1566_v50 }
 0x457   : > { %v2509_v51 = vpop.f32.mrf.mxu0 }
 0x458   : > { %v1472_v1 = vadd.f32 %v2509_v51, %v2289_v43 }
 0x459   : > { %v1466_v52 = vpop.f32.mrf.mxu0 }
 0x45a   : > { %v1467_v53 = vadd.f32 %v2288_v45, %v1466_v52  ;;  %v1581_v6 = vsel %vm412_vm1, %v1472_v1, -inf }
 0x45c   : > { %v1578_v54 = vsel %vm412_vm1, %v1467_v53, -inf }
 0x45d   : > { %1579 = vmax.xlane.f32.xlu1 %v1578_v54 }
 0x463   : > { %v2961_v57 = vpop.f32.mrf.mxu1 }
 0x465   : > { %v2963_v58 = vpop.f32.mrf.mxu1 }
 0x46b   : > { %v2502_v59 = vpop.f32.mrf.mxu1 }
 0x46c   : > { %v1381_v62 = vadd.f32 %v2502_v59, %v2289_v43 }
 0x46d   : > { %v1375_v60 = vpop.f32.mrf.mxu1 }
 0x46e   : > { %v1376_v61 = vadd.f32 %v2288_v45, %v1375_v60  ;;  %v1575_v2 = vsel %vm412_vm1, %v1381_v62, -inf }
 0x470   : > { %v1572_v63 = vsel %vm412_vm1, %v1376_v61, -inf }
 0x471   : > { %1573 = vmax.xlane.f32.xlu0 %v1572_v63 }
 0x473   : > { %v2516_v0 = vpop.f32.mrf.mxu1 }
 0x474   : > { %v1563_v5 = vadd.f32 %v2516_v0, %v2289_v43 }
 0x475   : > { %1576 = vmax.xlane.f32.xlu0 %v1575_v2  ;;  %v1557_v3 = vpop.f32.mrf.mxu1 }
 0x476   : > { %v1558_v4 = vadd.f32 %v2288_v45, %v1557_v3  ;;  %v1587_v8 = vsel %vm412_vm1, %v1563_v5, -inf }
 0x478   : > { %v1584_v7 = vsel %vm412_vm1, %v1558_v4, -inf }
 0x479   : > { %1582 = vmax.xlane.f32.xlu0 %v1581_v6  ;;  %1585 = vmax.xlane.f32.xlu1 %v1584_v7 }
 0x47d   : > { %1588 = vmax.xlane.f32.xlu0 %v1587_v8 }
 0x48a   : > { %1656 = vrot.lane.b32.xlu1 %v2739_v14, %s2663_s28 }
 0x48e   : > { %1743 = vrot.lane.b32.xlu1 %v2744_v20, %s2663_s28 }
 0x492   : > { %1741 = vrot.lane.b32.xlu1 %v2752_v23, %s2663_s28 }
 0x493   : > { %1654 = vrot.lane.b32.xlu0 %v2741_v17, %s2663_s28 }
 0x496   : > { %1828 = vrot.lane.b32.xlu1 %v2748_v22, %s2663_s28 }
 0x497   : > { %1830 = vrot.lane.b32.xlu0 %v2754_v24, %s2663_s28 }
 0x4b4   : > { %v1571_v9 = vpop.xlane.xlu1 %1570 }
 0x4b5   : > { %v1591_v10 = vsub.f32 %v1290_v46, %v1571_v9 }
 0x4b6   : > { %v1568_v11 = vpop.xlane.xlu0 %1567 }
 0x4b7   : > { %v1600_v12 = vmul.f32 1.442695, %v1591_v10  ;;  %v1590_v14 = vsub.f32 %v1285_v48, %v1568_v11 }
 0x4b9   : > { %2619 = vpow2.f32 %v1600_v12  ;;  %v1598_v13 = vmul.f32 1.442695, %v1590_v14 }
 0x4bb   : > { %2621 = vpow2.f32 %v1598_v13 }
 0x4c6   : > { %v2982_v20 = vpop.eup %2619 }
 0x4c7   : > { %v1617_v23 = vsel %vm412_vm1, %v2982_v20, 0.0 }
 0x4c8   : > { %v2986_v17 = vpop.eup %2621  ;;  %1618 = vadd.xlane.f32.xlu0 %v1617_v23 }
 0x4c9   : > { %v1614_v22 = vsel %vm412_vm1, %v2986_v17, 0.0 }
 0x4ca   : > { %1615 = vadd.xlane.f32.xlu1 %v1614_v22 }
 0x4e6   : > { %v1580_v24 = vpop.xlane.xlu1 %1579 }
 0x4e7   : > { %v1594_v16 = vsub.f32 %v1467_v53, %v1580_v24 }
 0x4e9   : > { %v1606_v15 = vmul.f32 1.442695, %v1594_v16 }
 0x4eb   : > { %2623 = vpow2.f32 %v1606_v15 }
 0x4f8   : > { %v2990_v18 = vpop.eup %2623 }
 0x4f9   : > { %v1626_v19 = vsel %vm412_vm1, %v2990_v18, 0.0 }
 0x4fa   : > { %v1574_v21 = vpop.xlane.xlu0 %1573  ;;  %1627 = vadd.xlane.f32.xlu1 %v1626_v19 }
 0x4fb   : > { %v1592_v25 = vsub.f32 %v1376_v61, %v1574_v21 }
 0x4fd   : > { %v1602_v27 = vmul.f32 1.442695, %v1592_v25  ;;  %v2045_v25 = vld [vmem:[%s3073_s4 + $0x18] sm:$0xff] }
 0x4fe   : > { %v1577_v29 = vpop.xlane.xlu0 %1576 }
 0x4ff   : > { %2625 = vpow2.f32 %v1602_v27  ;;  %v1593_v30 = vsub.f32 %v1381_v62, %v1577_v29  ;;  %v2044_v27 = vld [vmem:[%s3073_s4 + $0x10] sm:$0xff]  ;;  %v2043_v29 = vld [vmem:[%s3073_s4 + $0x8] sm:$0xff] }
 0x501   : > { %v1604_v37 = vmul.f32 1.442695, %v1593_v30  ;;  %v2042_v30 = vld [vmem:[%s3073_s4] sm:$0xff] }
 0x502   : > { %v1586_v31 = vpop.xlane.xlu1 %1585  ;;  %v1583_v32 = vpop.xlane.xlu0 %1582 }
 0x503   : > { %v1596_v33 = vsub.f32 %v1558_v4, %v1586_v31  ;;  %v1595_v34 = vsub.f32 %v1472_v1, %v1583_v32 }
 0x505   : > { %v1610_v35 = vmul.f32 1.442695, %v1596_v33  ;;  %v1608_v36 = vmul.f32 1.442695, %v1595_v34 }
 0x506   : > { %v1657_v38 = vpop.permute.xlu1 %1656  ;;  %v1589_v43 = vpop.xlane.xlu0 %1588 }
 0x507   : > { %2627 = vpow2.f32 %v1610_v35  ;;  %v1597_v44 = vsub.f32 %v1563_v5, %v1589_v43  ;;  %2517 = vmatprep.subr.mxu0 %v1657_v38 }
 0x508   : > { %2629 = vpow2.f32 %v1608_v36  ;;  %2518 = vmatpush3.msra.mxu0 %v1657_v38 }
 0x509   : > { %2631 = vpow2.f32 %v1604_v37  ;;  %v1612_v45 = vmul.f32 1.442695, %v1597_v44 }
 0x50a   : > { %v1744_v46 = vpop.permute.xlu1 %1743  ;;  %v1655_v47 = vpop.permute.xlu0 %1654 }
 0x50b   : > { %2519 = vmatprep.subr.mxu0 %v1655_v47  ;;  %2524 = vmatprep.subr.mxu1 %v1744_v46  ;;  %2633 = vpow2.f32 %v1612_v45 }
 0x50c   : > { %v2626_v48 = vpop.eup %2625  ;;  %2520 = vmatpush3.msra.mxu0 %v1655_v47  ;;  %2525 = vmatpush3.msra.mxu1 %v1744_v46 }
 0x50d   : > { %v1620_v49 = vsel %vm412_vm1, %v2626_v48, 0.0 }
 0x50e   : > { %v1742_v50 = vpop.permute.xlu1 %1741  ;;  %1621 = vadd.xlane.f32.xlu1 %v1620_v49  ;;  %v1831_v51 = vpop.permute.xlu0 %1830 }
 0x50f   : > { %2526 = vmatprep.subr.mxu1 %v1742_v50  ;;  %2531 = vmatprep.subr.mxu0 %v1831_v51 }
 0x510   : > { %2527 = vmatpush3.msra.mxu1 %v1742_v50 }
 0x512   : > { %v1829_v0 = vpop.permute.xlu1 %1828 }
 0x514   : > { %v2628_v52 = vpop.eup %2627 }
 0x515   : > { %v2630_v53 = vpop.eup %2629  ;;  %v1632_v54 = vsel %vm412_vm1, %v2628_v52, 0.0 }
 0x516   : > { %1633 = vadd.xlane.f32.xlu1 %v1632_v54  ;;  %v1629_v59 = vsel %vm412_vm1, %v2630_v53, 0.0  ;;  %v2632_v60 = vpop.eup %2631 }
 0x517   : > { %1630 = vadd.xlane.f32.xlu0 %v1629_v59  ;;  %v1623_v61 = vsel %vm412_vm1, %v2632_v60, 0.0 }
 0x518   : > { %v2634_v62 = vpop.eup %2633 }
 0x519   : > { %v1635_v63 = vsel %vm412_vm1, %v2634_v62, 0.0 }
 0x51b   : > { %1624 = vadd.xlane.f32.xlu0 %v1623_v61 }
 0x51f   : > { %1636 = vadd.xlane.f32.xlu0 %v1635_v63 }
 0x527   : > { %1915 = vrot.lane.b32.xlu1 %v2763_v28, %s2663_s28 }
 0x535   : > { %1917 = vrot.lane.b32.xlu0 %v2760_v26, %s2663_s28 }
 0x551   : > { %v1619_v1 = vpop.xlane.xlu0 %1618 }
 0x552   : > { %2635 = vrcp.f32 %v1619_v1 }
 0x553   : > { %v1616_v2 = vpop.xlane.xlu1 %1615 }
 0x554   : > { %2637 = vrcp.f32 %v1616_v2 }
 0x55f   : > { %v2636_v3 = vpop.eup %2635 }
 0x560   : > { %v1641_v6 = vmul.f32 %v2636_v3, %v2982_v20 }
 0x561   : > { %v2638_v4 = vpop.eup %2637 }
 0x562   : > { %v1639_v5 = vmul.f32 %v2638_v4, %v2986_v17 }
 0x564   : > { %2521 = vmatprep.mubr.msk.f32.mxu0 %vm412_vm1, %v1639_v5 }
 0x565   : > { %2522 = vmatmul.mubr.msk.f32.vlgmr.msra.gmra.mxu0 %vm412_vm1, %v1641_v6 }
 0x566   : > { %2532 = vmatpush3.msra.mxu0 %v1831_v51 }
 0x567   : > { %2533 = vmatprep.subr.mxu0 %v1829_v0 }
 0x568   : > { %2534 = vmatpush3.msra.mxu0 %v1829_v0 }
 0x569   : > { %2545 = vmatprep.subr.mxu0 %v2045_v25 }
 0x583   : > { %v1628_v28 = vpop.xlane.xlu1 %1627 }
 0x584   : > { %2639 = vrcp.f32 %v1628_v28 }
 0x591   : > { %v2640_v26 = vpop.eup %2639 }
 0x592   : > { %v1647_v7 = vmul.f32 %v2640_v26, %v2990_v18 }
 0x594   : > { %2535 = vmatprep.mubr.msk.f32.mxu0 %vm412_vm1, %v1647_v7 }
 0x597   : > { %v1622_v8 = vpop.xlane.xlu1 %1621 }
 0x598   : > { %2641 = vrcp.f32 %v1622_v8 }
 0x59f   : > { %v1634_v10 = vpop.xlane.xlu1 %1633 }
 0x5a0   : > { %v1631_v9 = vpop.xlane.xlu0 %1630 }
 0x5a1   : > { %2643 = vrcp.f32 %v1631_v9 }
 0x5a2   : > { %2645 = vrcp.f32 %v1634_v10 }
 0x5a3   : > { %v1916_v19 = vpop.permute.xlu1 %1915 }
 0x5a4   : > { %v1625_v11 = vpop.xlane.xlu0 %1624 }
 0x5a5   : > { %v2642_v12 = vpop.eup %2641  ;;  %2647 = vrcp.f32 %v1625_v11 }
 0x5a6   : > { %v1643_v14 = vmul.f32 %v2642_v12, %v2626_v48 }
 0x5a8   : > { %v1637_v13 = vpop.xlane.xlu0 %1636  ;;  %2528 = vmatprep.mubr.msk.f32.mxu1 %vm412_vm1, %v1643_v14 }
 0x5a9   : > { %2649 = vrcp.f32 %v1637_v13 }
 0x5ac   : > { %v1918_v20 = vpop.permute.xlu0 %1917 }
 0x5ad   : > { %2538 = vmatprep.subr.mxu1 %v1918_v20 }
 0x5ae   : > { %v2644_v23 = vpop.eup %2643 }
 0x5af   : > { %v1649_v17 = vmul.f32 %v2644_v23, %v2630_v53  ;;  %v2646_v22 = vpop.eup %2645 }
 0x5b0   : > { %v1651_v15 = vmul.f32 %v2646_v22, %v2628_v52 }
 0x5b1   : > { %2536 = vmatmul.mubr.msk.f32.vlgmr.msra.gmra.mxu0 %vm412_vm1, %v1649_v17 }
 0x5b2   : > { %v2648_v24 = vpop.eup %2647  ;;  %2546 = vmatpush3.msra.mxu0 %v2045_v25 }
 0x5b3   : > { %v1645_v16 = vmul.f32 %v2648_v24, %v2632_v60  ;;  %2547 = vmatprep.subr.mxu0 %v2044_v27 }
 0x5b4   : > { %2548 = vmatpush3.msra.mxu0 %v2044_v27 }
 0x5b5   : > { %2529 = vmatmul.mubr.msk.f32.vlgmr.msra.gmra.mxu1 %vm412_vm1, %v1645_v16  ;;  %2549 = vmatprep.subr.mxu0 %v2043_v29 }
 0x5b6   : > { %v2650_v18 = vpop.eup %2649  ;;  %2539 = vmatpush3.msra.mxu1 %v1918_v20  ;;  %2542 = vmatprep.mubr.msk.f32.mxu1 %vm412_vm1, %v1651_v15 }
 0x5b7   : > { %2540 = vmatprep.subr.mxu1 %v1916_v19  ;;  %v1653_v21 = vmul.f32 %v2650_v18, %v2634_v62  ;;  %2550 = vmatpush3.msra.mxu0 %v2043_v29 }
 0x5b8   : > { %2541 = vmatpush3.msra.mxu1 %v1916_v19  ;;  %2551 = vmatprep.subr.mxu0 %v2042_v30 }
 0x5b9   : > { %2543 = vmatmul.mubr.msk.f32.vlgmr.msra.gmra.mxu1 %vm412_vm1, %v1653_v21  ;;  %2552 = vmatpush3.msra.mxu0 %v2042_v30 }
 0x625   : > { %v2523_v31 = vpop.f32.mrf.mxu0 }
 0x626   : > { %2012 = vrot.lane.b32.xlu1 %v2523_v31, %s2664_s14 }
 0x627   : > { %v1732_v32 = vpop.f32.mrf.mxu0 }
 0x628   : > { %2010 = vrot.lane.b32.xlu0 %v1732_v32, %s2664_s14 }
 0x671   : > { %v2537_v34 = vpop.f32.mrf.mxu0 }
 0x673   : > { %v1906_v36 = vpop.f32.mrf.mxu0 }
 0x675   : > { %v2530_v33 = vpop.f32.mrf.mxu1 }
 0x676   : > { %2016 = vrot.lane.b32.xlu1 %v2530_v33, %s2664_s14 }
 0x677   : > { %v1819_v35 = vpop.f32.mrf.mxu1 }
 0x678   : > { %2014 = vrot.lane.b32.xlu0 %v1819_v35, %s2664_s14 }
 0x679   : > { %v2544_v37 = vpop.f32.mrf.mxu1 }
 0x67a   : > { %2020 = vrot.lane.b32.xlu1 %v2537_v34, %s2664_s14 }
 0x67b   : > { %v1993_v38 = vpop.f32.mrf.mxu1 }
 0x67c   : > { %2018 = vrot.lane.b32.xlu0 %v1906_v36, %s2664_s14 }
 0x67e   : > { %2024 = vrot.lane.b32.xlu1 %v2544_v37, %s2664_s14 }
 0x680   : > { %2022 = vrot.lane.b32.xlu0 %v1993_v38, %s2664_s14 }
 0x698   : > { %v2013_v43 = vpop.permute.xlu1 %2012 }
 0x699   : > { %v2035_v46 = vsel %vm412_vm1, %v2940_v39, %v2013_v43 }
 0x69a   : > { %v2011_v44 = vpop.permute.xlu0 %2010 }
 0x69b   : > { %v2034_v45 = vsel %vm412_vm1, %v2942_v40, %v2011_v44 }
 0x69c   : > { %2553 = vmatprep.mubr.msk.f32.mxu0 %vm274_vm0, %v2034_v45 }
 0x69d   : > { %2554 = vmatmul.mubr.msk.f32.vlgmr.msra.gmra.mxu0 %vm274_vm0, %v2035_v46 }
 0x6e8   : > { %v2017_v47 = vpop.permute.xlu1 %2016 }
 0x6e9   : > { %v2037_v50 = vsel %vm412_vm1, %v2957_v55, %v2017_v47 }
 0x6ea   : > { %v2015_v48 = vpop.permute.xlu0 %2014 }
 0x6eb   : > { %v2036_v49 = vsel %vm412_vm1, %v2959_v56, %v2015_v48 }
 0x6ec   : > { %v2021_v51 = vpop.permute.xlu1 %2020  ;;  %2556 = vmatprep.mubr.msk.f32.mxu0 %vm274_vm0, %v2036_v49 }
 0x6ed   : > { %2557 = vmatmul.mubr.msk.f32.gmra.mxu0 %vm274_vm0, %v2037_v50  ;;  %v2039_v52 = vsel %vm412_vm1, %v2944_v41, %v2021_v51  ;;  %v2314_v41 = vld [vmem:[%s3074_s5] ss:$0 sm:$0xff] }
 0x6ee   : > { %v2019_v40 = vpop.permute.xlu0 %2018 }
 0x6ef   : > { %v2038_v39 = vsel %vm412_vm1, %v2946_v42, %v2019_v40 }
 0x6f0   : > { %2559 = vmatprep.mubr.msk.f32.mxu0 %vm274_vm0, %v2038_v39  ;;  %v2025_v53 = vpop.permute.xlu1 %2024 }
 0x6f1   : > { %2560 = vmatmul.mubr.msk.f32.gmra.mxu0 %vm274_vm0, %v2039_v52  ;;  %v2041_v54 = vsel %vm412_vm1, %v2961_v57, %v2025_v53 }
 0x6f2   : > { %v2023_v56 = vpop.permute.xlu0 %2022 }
 0x6f3   : > { %v2040_v55 = vsel %vm412_vm1, %v2963_v58, %v2023_v56 }
 0x6f4   : > { %2562 = vmatprep.mubr.msk.f32.mxu0 %vm274_vm0, %v2040_v55 }
 0x6f5   : > { %2563 = vmatmul.mubr.msk.f32.gmra.mxu0 %vm274_vm0, %v2041_v54 }
 0x75d   : > { %v2555_v42 = vpop.f32.mrf.mxu0 }
 0x75e   : > { %v2149_v59 = vadd.f32 %v2555_v42, %v2314_v41 }
 0x75f   : > { %v2143_v60 = vpop.f32.mrf.mxu0 }
 0x760   : > { %2183 = vst.msk [vmem:[%s253_s19 + $0x8] sm:$0xff] %vm274_vm0, %v2149_v59  ;;  %v2144_v58 = vadd.f32 %v2314_v41, %v2143_v60 }
 0x762   : > { %2182 = vst.msk [vmem:[%s253_s19] sm:$0xff] %vm274_vm0, %v2144_v58 }
 0x7ad   : > { %v2558_v57 = vpop.f32.mrf.mxu0 }
 0x7ae   : > { %v2159_v61 = vadd.f32 %v2558_v57, %v2314_v41 }
 0x7af   : > { %v2153_v62 = vpop.f32.mrf.mxu0 }
 0x7b0   : > { %2185 = vst.msk [vmem:[%s253_s19 + $0x18] sm:$0xff] %vm274_vm0, %v2159_v61  ;;  %v2154_v63 = vadd.f32 %v2314_v41, %v2153_v62 }
 0x7b1   : > { %v2561_v0 = vpop.f32.mrf.mxu0 }
 0x7b2   : > { %2184 = vst.msk [vmem:[%s253_s19 + $0x10] sm:$0xff] %vm274_vm0, %v2154_v63  ;;  %v2169_v1 = vadd.f32 %v2561_v0, %v2314_v41 }
 0x7b3   : > { %v2163_v2 = vpop.f32.mrf.mxu0 }
 0x7b4   : > { %2187 = vst.msk [vmem:[%s253_s19 + $0x28] sm:$0xff] %vm274_vm0, %v2169_v1  ;;  %v2164_v3 = vadd.f32 %v2314_v41, %v2163_v2 }
 0x7b5   : > { %v2564_v4 = vpop.f32.mrf.mxu0 }
 0x7b6   : > { %2186 = vst.msk [vmem:[%s253_s19 + $0x20] sm:$0xff] %vm274_vm0, %v2164_v3  ;;  %v2179_v5 = vadd.f32 %v2564_v4, %v2314_v41 }
 0x7b7   : > { %v2173_v6 = vpop.f32.mrf.mxu0 }
 0x7b8   : > { %2189 = vst.msk [vmem:[%s253_s19 + $0x38] sm:$0xff] %vm274_vm0, %v2179_v5  ;;  %v2174_v28 = vadd.f32 %v2314_v41, %v2173_v6 }
 0x7ba   : > { %2188 = vst.msk [vmem:[%s253_s19 + $0x30] sm:$0xff] %vm274_vm0, %v2174_v28 }
 0x7bb PF: > { %s16_s21 = sadd.s32 1, %s2657_s21  }
 0x7bc   : > { %p13_p4 = scmp.ge.s32.totalorder %s16_s21, 4  }
 0x7be   :  { %15 = sbr.rel (!%p13_p4) target bundleno = 1 (0x1), region = 75 }

</bundles_post_ra>
